<compile_context>
chip_gen: v5e
topology: v5e:2x2
jax: 0.10.0
libtpu: 0.0.40
codegen_flags: <defaults>
</compile_context>

<pallas_src>
import functools

import jax
import jax.numpy as jnp
from jax.experimental import pallas as pl
from jax.experimental.pallas import tpu as pltpu


def _round_up(x, m):
    return ((x + m - 1) // m) * m


def _ln_kernel(x_ref, gamma_ref, beta_ref, o_ref, *, eps, inv_c):
    # x_ref: (C, T) or (C, TS, 128) tile — channel axis first; stats reduce
    # over axis 0 (per spatial position).
    x = x_ref[...].astype(jnp.float32)
    # Single traversal: both sums computed from one read of the tile.
    s = jnp.sum(x, axis=0, keepdims=True)
    ss = jnp.sum(x * x, axis=0, keepdims=True)
    mean = s * inv_c
    var = ss * inv_c - mean * mean                 # biased variance (LayerNorm)
    inv = jax.lax.rsqrt(var + eps)
    gamma = gamma_ref[...]                         # f32, (C,1) / (C,1,1): broadcasts over spatial axes
    beta = beta_ref[...]
    o_ref[...] = ((x - mean) * inv * gamma + beta).astype(o_ref.dtype)


def layer_norm_nchw(x, gamma, beta, *, eps=1e-5, target_block_bytes_f32=4 << 20):
    """x: (N, C, H, W). gamma, beta: (C,). Returns (N, C, H, W)."""
    N, C, H, W = x.shape
    HW = H * W
    itemsize = jnp.dtype(x.dtype).itemsize

    # Sublanes per vreg for this dtype (f32: 8, bf16: 16, int8: 32). If C is
    # smaller, the (C, HW) sublane layout wastes vreg capacity -> use 3-D path.
    sublanes_per_vreg = 8 * max(1, 4 // itemsize)
    use_3d = (HW % 128 == 0) and (C < sublanes_per_vreg)

    gamma_f32 = gamma.astype(jnp.float32)
    beta_f32 = beta.astype(jnp.float32)

    kernel = functools.partial(_ln_kernel, eps=eps, inv_c=1.0 / C)

    cost = pl.CostEstimate(
        flops=8 * N * C * HW,
        transcendentals=N * HW,                      # one rsqrt per spatial position
        bytes_accessed=2 * N * C * HW * itemsize,    # one read + one write
    )
    compiler_params = pltpu.CompilerParams(
        dimension_semantics=("parallel", "parallel"),
        vmem_limit_bytes=32 << 20,
    )

    if use_3d:
        S = HW // 128
        # Tile sized from the f32 working set (intermediates are f32 even for
        # bf16/int8 inputs).
        per_s_bytes = C * 128 * 4
        tile_s = max(target_block_bytes_f32 // per_s_bytes, 8)
        tile_s = (tile_s // 8) * 8
        if tile_s >= S:
            tile_s = S                               # full extent always legal
        num_tiles = pl.cdiv(S, tile_s)
        # Guarantee >= 2 grid programs so v7x megacore sharding engages.
        if N * num_tiles < 2 and S > 8:
            tile_s = max(8, _round_up(pl.cdiv(S, 2), 8))
            num_tiles = pl.cdiv(S, tile_s)

        x4 = x.reshape(N, C, S, 128)                 # free, contiguous view
        g = gamma_f32.reshape(C, 1, 1)
        b = beta_f32.reshape(C, 1, 1)

        out = pl.pallas_call(
            kernel,
            out_shape=jax.ShapeDtypeStruct((N, C, S, 128), x.dtype),
            grid_spec=pltpu.PrefetchScalarGridSpec(
                num_scalar_prefetch=0,
                grid=(N, num_tiles),
                in_specs=[
                    # N squeezed; kernel sees (C, tile_s, 128).
                    pl.BlockSpec((None, C, tile_s, 128), lambda n, j: (n, 0, j, 0)),
                    pl.BlockSpec((C, 1, 1), lambda n, j: (0, 0, 0)),
                    pl.BlockSpec((C, 1, 1), lambda n, j: (0, 0, 0)),
                ],
                out_specs=pl.BlockSpec((None, C, tile_s, 128), lambda n, j: (n, 0, j, 0)),
            ),
            compiler_params=compiler_params,
            cost_estimate=cost,
        )(x4, g, b)
        return out.reshape(N, C, H, W)

    # ---- 2-D fallback: (C, TILE_HW) tiles, C on sublanes, HW on lanes. ----
    x3 = x.reshape(N, C, HW)                         # free, contiguous view
    if HW <= 128:
        tile_hw = HW                                 # full extent always legal
    else:
        per_col_bytes = C * 4                        # f32 working set per lane column
        tile_hw = max(target_block_bytes_f32 // per_col_bytes, 128)
        tile_hw = (tile_hw // 128) * 128
        tile_hw = min(tile_hw, _round_up(HW, 128))
    num_tiles = pl.cdiv(HW, tile_hw)
    # Guarantee >= 2 grid programs so v7x megacore sharding engages.
    if N * num_tiles < 2 and HW > 128:
        tile_hw = max(128, _round_up(pl.cdiv(HW, 2), 128))
        num_tiles = pl.cdiv(HW, tile_hw)

    g = gamma_f32.reshape(C, 1)
    b = beta_f32.reshape(C, 1)

    out = pl.pallas_call(
        kernel,
        out_shape=jax.ShapeDtypeStruct((N, C, HW), x.dtype),
        grid_spec=pltpu.PrefetchScalarGridSpec(
            num_scalar_prefetch=0,
            grid=(N, num_tiles),
            in_specs=[
                # N squeezed; kernel sees (C, tile_hw).
                pl.BlockSpec((None, C, tile_hw), lambda n, j: (n, 0, j)),
                pl.BlockSpec((C, 1), lambda n, j: (0, 0)),
                pl.BlockSpec((C, 1), lambda n, j: (0, 0)),
            ],
            out_specs=pl.BlockSpec((None, C, tile_hw), lambda n, j: (n, 0, j)),
        ),
        compiler_params=compiler_params,
        cost_estimate=cost,
    )(x3, g, b)
    return out.reshape(N, C, H, W)


def layer_norm_nchw_ref(x, gamma, beta, eps=1e-5):
    # Pure-JAX reference mirroring the PyTorch module (permute -> LayerNorm(C) -> permute).
    xt = jnp.transpose(x, (0, 2, 3, 1)).astype(jnp.float32)
    mean = jnp.mean(xt, axis=-1, keepdims=True)
    var = jnp.mean((xt - mean) ** 2, axis=-1, keepdims=True)
    y = (xt - mean) / jnp.sqrt(var + eps)
    y = y * gamma + beta
    return jnp.transpose(y, (0, 3, 1, 2)).astype(x.dtype)


if __name__ == "__main__":
    key = jax.random.PRNGKey(0)

    # Primary check (exercises the small-C 3-D layout path): C=4, HW=256.
    N, C, H, W = 2, 4, 16, 16  # normalized_shape = C = 4
    kx, kg, kb, kx2, kg2, kb2 = jax.random.split(key, 6)
    x = jax.random.normal(kx, (N, C, H, W), dtype=jnp.float32)
    # PyTorch inits gamma=1, beta=0; perturb deterministically so the affine
    # path is actually exercised.
    gamma = 1.0 + 0.1 * jax.random.normal(kg, (C,), dtype=jnp.float32)
    beta = 0.1 * jax.random.normal(kb, (C,), dtype=jnp.float32)

    out = layer_norm_nchw(x, gamma, beta, eps=1e-5)
    out = jax.block_until_ready(out)
    ref = layer_norm_nchw_ref(x, gamma, beta, eps=1e-5)
    assert out.shape == (N, C, H, W)
    # Single-pass E[x^2]-E[x]^2 variance in f32 vs two-pass reference:
    # slightly looser tolerance than exact bitwise-equivalent math.
    assert jnp.allclose(out, ref, atol=1e-4, rtol=1e-4), "mismatch vs reference (3-D path)"

    # Secondary check (exercises the generic 2-D fallback path): C=16, HW=81.
    N2, C2, H2, W2 = 1, 16, 9, 9
    x2 = jax.random.normal(kx2, (N2, C2, H2, W2), dtype=jnp.float32)
    gamma2 = 1.0 + 0.1 * jax.random.normal(kg2, (C2,), dtype=jnp.float32)
    beta2 = 0.1 * jax.random.normal(kb2, (C2,), dtype=jnp.float32)

    out2 = layer_norm_nchw(x2, gamma2, beta2, eps=1e-5)
    out2 = jax.block_until_ready(out2)
    ref2 = layer_norm_nchw_ref(x2, gamma2, beta2, eps=1e-5)
    assert out2.shape == (N2, C2, H2, W2)
    assert jnp.allclose(out2, ref2, atol=1e-4, rtol=1e-4), "mismatch vs reference (2-D path)"

    print("KERNEL_OK")
</pallas_src>

<mosaic_0001>
module attributes {stable_mosaic.version = 11 : i64} {
  func.func @_ln_kernel(%arg0: i32, %arg1: i32, %arg2: memref<1x4x2x128xf32, #tpu.memory_space<vmem>>, %arg3: memref<4x1x1xf32, #tpu.memory_space<vmem>>, %arg4: memref<4x1x1xf32, #tpu.memory_space<vmem>>, %arg5: memref<1x4x2x128xf32, #tpu.memory_space<vmem>>) attributes {dimension_semantics = [#tpu.dimension_semantics<parallel>, #tpu.dimension_semantics<parallel>], iteration_bounds = array<i64: 2, 1>, scalar_prefetch = 0 : i64, scratch_operands = 0 : i64, tpu.core_type = #tpu.core_type<tc>, window_params = [{transform_indices = @transform_0, window_bounds = array<i64: 1, 4, 2, 128>}, {pipeline_mode = #tpu.pipeline_mode<synchronous>, transform_indices = @transform_1, window_bounds = array<i64: 4, 1, 1>}, {pipeline_mode = #tpu.pipeline_mode<synchronous>, transform_indices = @transform_2, window_bounds = array<i64: 4, 1, 1>}, {transform_indices = @transform_3, window_bounds = array<i64: 1, 4, 2, 128>}]} {
    %c0 = arith.constant 0 : index
    %c0_0 = arith.constant 0 : index
    %c0_1 = arith.constant 0 : index
    %c0_2 = arith.constant 0 : index
    %0 = vector.load %arg2[%c0, %c0_0, %c0_1, %c0_2] : memref<1x4x2x128xf32, #tpu.memory_space<vmem>>, vector<1x4x2x128xf32>
    %1 = vector.shape_cast %0 : vector<1x4x2x128xf32> to vector<4x2x128xf32>
    %cst = arith.constant dense<0.000000e+00> : vector<2x128xf32>
    %2 = vector.multi_reduction <add>, %1, %cst [0] : vector<4x2x128xf32> to vector<2x128xf32>
    %3 = vector.shape_cast %2 : vector<2x128xf32> to vector<1x2x128xf32>
    %4 = arith.mulf %1, %1 : vector<4x2x128xf32>
    %cst_3 = arith.constant dense<0.000000e+00> : vector<2x128xf32>
    %5 = vector.multi_reduction <add>, %4, %cst_3 [0] : vector<4x2x128xf32> to vector<2x128xf32>
    %6 = vector.shape_cast %5 : vector<2x128xf32> to vector<1x2x128xf32>
    %cst_4 = arith.constant 2.500000e-01 : f32
    %7 = vector.broadcast %cst_4 : f32 to vector<1x2x128xf32>
    %8 = arith.mulf %3, %7 : vector<1x2x128xf32>
    %cst_5 = arith.constant 2.500000e-01 : f32
    %9 = vector.broadcast %cst_5 : f32 to vector<1x2x128xf32>
    %10 = arith.mulf %6, %9 : vector<1x2x128xf32>
    %11 = arith.mulf %8, %8 : vector<1x2x128xf32>
    %12 = arith.subf %10, %11 : vector<1x2x128xf32>
    %cst_6 = arith.constant 9.99999974E-6 : f32
    %13 = vector.broadcast %cst_6 : f32 to vector<1x2x128xf32>
    %14 = arith.addf %12, %13 : vector<1x2x128xf32>
    %15 = math.rsqrt %14 : vector<1x2x128xf32>
    %c0_7 = arith.constant 0 : index
    %c0_8 = arith.constant 0 : index
    %c0_9 = arith.constant 0 : index
    %16 = vector.load %arg3[%c0_7, %c0_8, %c0_9] : memref<4x1x1xf32, #tpu.memory_space<vmem>>, vector<4x1x1xf32>
    %c0_10 = arith.constant 0 : index
    %c0_11 = arith.constant 0 : index
    %c0_12 = arith.constant 0 : index
    %17 = vector.load %arg4[%c0_10, %c0_11, %c0_12] : memref<4x1x1xf32, #tpu.memory_space<vmem>>, vector<4x1x1xf32>
    %18 = vector.broadcast %8 : vector<1x2x128xf32> to vector<4x2x128xf32>
    %19 = arith.subf %1, %18 : vector<4x2x128xf32>
    %20 = vector.broadcast %15 : vector<1x2x128xf32> to vector<4x2x128xf32>
    %21 = arith.mulf %19, %20 : vector<4x2x128xf32>
    %22 = vector.broadcast %16 : vector<4x1x1xf32> to vector<4x2x128xf32>
    %23 = arith.mulf %21, %22 : vector<4x2x128xf32>
    %24 = vector.broadcast %17 : vector<4x1x1xf32> to vector<4x2x128xf32>
    %25 = arith.addf %23, %24 : vector<4x2x128xf32>
    %c0_13 = arith.constant 0 : index
    %c0_14 = arith.constant 0 : index
    %c0_15 = arith.constant 0 : index
    %c0_16 = arith.constant 0 : index
    %26 = vector.load %arg5[%c0_13, %c0_14, %c0_15, %c0_16] : memref<1x4x2x128xf32, #tpu.memory_space<vmem>>, vector<1x4x2x128xf32>
    %27 = vector.shape_cast %26 : vector<1x4x2x128xf32> to vector<4x2x128xf32>
    %28 = vector.shape_cast %25 : vector<4x2x128xf32> to vector<1x4x2x128xf32>
    tpu.vector_store %arg5[%c0_13, %c0_14, %c0_15, %c0_16], %28 {strides = array<i32>} : memref<1x4x2x128xf32, #tpu.memory_space<vmem>>, vector<1x4x2x128xf32>,
    return
  }
  func.func @transform_0(%arg0: i32, %arg1: i32) -> (i32, i32, i32, i32) {
    %c0_i32 = arith.constant 0 : i32
    %c0_i32_0 = arith.constant 0 : i32
    %c0_i32_1 = arith.constant 0 : i32
    return %arg0, %c0_i32, %arg1, %c0_i32_0 : i32, i32, i32, i32
  }
  func.func @transform_1(%arg0: i32, %arg1: i32) -> (i32, i32, i32) {
    %c0_i32 = arith.constant 0 : i32
    %c0_i32_0 = arith.constant 0 : i32
    %c0_i32_1 = arith.constant 0 : i32
    %c0_i32_2 = arith.constant 0 : i32
    return %c0_i32, %c0_i32_0, %c0_i32_1 : i32, i32, i32
  }
  func.func @transform_2(%arg0: i32, %arg1: i32) -> (i32, i32, i32) {
    %c0_i32 = arith.constant 0 : i32
    %c0_i32_0 = arith.constant 0 : i32
    %c0_i32_1 = arith.constant 0 : i32
    %c0_i32_2 = arith.constant 0 : i32
    return %c0_i32, %c0_i32_0, %c0_i32_1 : i32, i32, i32
  }
  func.func @transform_3(%arg0: i32, %arg1: i32) -> (i32, i32, i32, i32) {
    %c0_i32 = arith.constant 0 : i32
    %c0_i32_0 = arith.constant 0 : i32
    %c0_i32_1 = arith.constant 0 : i32
    return %arg0, %c0_i32, %arg1, %c0_i32_0 : i32, i32, i32, i32
  }
}

</mosaic_0001>

<bundles_post_ra>
// kernel: tpu_custom_call.1
= control target key start
LH: loop header
LB: loop body
LE: loop exit
PB: predicated region body
PF: predicated region fallthrough
CT: control target
= control target key end

     0   :  { %8 = vsyncpa [#allocation3], 0  ;;  %s822_s0 = inlined_call_operand.hbm [shape: f32[2,4,2,128], index: 0, kind: input, shape index: {}]   ;;  %s823_s1 = inlined_call_operand.vmem [shape: f32[4,1,1], index: 1, kind: input, shape index: {}]   ;;  %s824_s2 = inlined_call_operand.vmem [shape: f32[4,1,1], index: 2, kind: input, shape index: {}]   ;;  %s825_s3 = inlined_call_operand.hbm [shape: f32[2,4,2,128], index: 3, kind: output, shape index: {}]  }
   0x1   :  { %10 = vsyncpa [#allocation3 + $0x1], 0 }
   0x2   :  { %11 = vsyncpa [#allocation4], 0 }
   0x3   :  { %13 = vsyncpa [#allocation4 + $0x1], 0  ;;  %s660_s12 = smov 0   ;;  %s662_s13 = smov 0  }
   0x4   :  { %s664_s14 = smov 0   ;;  %s666_s15 = smov 0  }
   0x5   :  { %s668_s16 = smov 0   ;;  %s670_s17 = smov 0  }
   0x6 LB: > { %s424_s18 = sadd.s32 4294967295, %s633_s17   ;;  %s425_s19 = sadd.s32 4294967294, %s633_s17   ;;  %s633_s17 = sphi %s670_s17, %s19_s17   ;;  %s629_s16 = sphi %s668_s16, %s834_s16   ;;  %s625_s15 = sphi %s666_s15, %s833_s15   ;;  %s621_s14 = sphi %s664_s14, %s832_s14   ;;  %s617_s13 = sphi %s662_s13, %s831_s13   ;;  %s613_s12 = sphi %s660_s12, %s830_s12  }
   0x7   : > { %s31_s20 = sadd.s32 1, %s629_s16  ;;  %s40_s21 = sadd.s32 1, %s621_s14 }
   0x8   : > { %p33_p0 = scmp.ge.s32.totalorder %s31_s20, 2  ;;  %p47_p1 = scmp.ne.s32.totalorder %s621_s14, %s617_s13 }
   0x9   : > { %p48_p2 = scmp.eq.s32.totalorder %s633_s17, 0  ;;  %p53_p3 = scmp.ne.s32.totalorder %s617_s13, %s613_s12 }
   0xa   : > { %s836_s20 = smov (%p33_p0, %s31_s20), 0  ;;  %p54_p5 = scmp.eq.s32.totalorder %s424_s18, 0 }
   0xb   : > { %p701_p4 = por %p48_p2, %p47_p1  ;;  %s35_s23 = ssub.s32 %s629_s16, %s836_s20 }
   0xc   : > { %p121_p6 = scmp.eq.s32.totalorder %s424_s18, 1  ;;  %p38_p7 = scmp.eq.s32.totalorder %s35_s23, 0 }
   0xd   : > { %p707_p8 = por %p54_p5, %p53_p3  ;;  %p127_p10 = scmp.eq.s32.totalorder %s425_s19, 1 }
   0xe   : > { %p711_p9 = por %p121_p6, %p47_p1  ;;  %p427_p12 = scmp.ge.s32.totalorder %s633_s17, 2 }
   0xf   : > { %s716_s26 = scalar_select %p38_p7, %s621_s14, %s40_s21  }
  0x10   : > { %p718_p11 = por %p127_p10, %p53_p3  ;;  %p453_p13 = scmp.lt.s32.totalorder %s633_s17, 2 }
  0x11   : > { %s153_s28 = sand.u32 1, %s621_s14   ;;  %s439_s30 = sshll.u32 %s629_s16, 3 }
  0x12   : > { %s428_s29 = sshll.u32 %s153_s28, 3  ;;  %s163_s6 = scalar_lea.hbm %s822_s0, %s439_s30 }
  0x13   : > { %s157_s7 = scalar_lea.vmem [#allocation2], %s428_s29  ;;  %s164_s9 = sshll.u32 %s163_s6, 4  ;;  %s165_s9 = int_to_ptr.hbm [resolvable:$true] %s164_s9 }
  0x14   : > { %s166_s8 = sshll.u32 %s157_s7, 4  ;;  %p446_p0 = pnand %p453_p13, %p701_p4  ;;  %s167_s8 = int_to_ptr.vmem [resolvable:$true] %s166_s8 }
  0x15   : > { %p431_p1 = scmp.ge.s32.totalorder %s633_s17, 1  ;;  %s154_s10 = scalar_lea.sflag [#allocation3], %s153_s28 }
  0x16   : > { %s635_s11 = smov 32   ;;  %s636_s18 = smov 2  }
  0x17   : > { %448 = dma.hbm_to_vmem [thread:$0]  (!%p446_p0), %s165_s9, 128, %s167_s8, %s154_s10, %s635_s11, %s635_s11, %s636_s18  }
  0x18   : > { %p174_p2 = scmp.lt.s32.totalorder %s633_s17, 3 }
  0x1a   : > { %p175_p3 = pnand %p431_p1, %p174_p2 }
  0x1b   : > { %s734_s19 = sand.u32 (!%p175_p3), 1, %s617_s13  }
  0x1c   : > { %178 = sbr.rel (%p175_p3) target bundleno = 174 (0xae), region = 32  ;;  %s432_s21 = sshll.u32 (!%p175_p3), %s734_s19, 3 }
  0x1d   : > { %s181_s23 = scalar_lea.sflag (!%p175_p3), [#allocation3], %s734_s19  ;;  %s740_s22 = scalar_lea.vmem (!%p175_p3), [#allocation2], %s432_s21 }
  0x21   : > { %604 = dma.done.wait (%p707_p8), %s181_s23, 128  }
  0x22   : > { %606 = vsyncadd (%p707_p8), %s181_s23, 4294967168  ;;  %v637_v0 = vmov 0   ;;  %v511_v1 = vld [vmem:[%s823_s1 + $0x2] ss:$0 sm:$0xff]  ;;  %v512_v2 = vld [vmem:[%s823_s1] ss:$0 sm:$0xff] }
  0x23   : > { %509 = vset.pattern.permute.xlu1 %v637_v0  ;;  %508 = vset.pattern.permute.xlu0 %v637_v0  ;;  %v517_v3 = vld [vmem:[%s824_s2] ss:$0 sm:$0xff]  ;;  %v513_v4 = vld [vmem:[%s823_s1 + $0x3] ss:$0 sm:$0xff]  ;;  %v514_v5 = vld [vmem:[%s823_s1 + $0x1] ss:$0 sm:$0xff] }
  0x24   : > { %510 = vset.pattern.permute.xlu2 %v637_v0  ;;  %279 = vperm.xlu1 %509, %v511_v1   ;;  %v518_v6 = vld [vmem:[%s824_s2 + $0x1] ss:$0 sm:$0xff]  ;;  %v515_v7 = vld [vmem:[%s824_s2 + $0x3] ss:$0 sm:$0xff]  ;;  %v516_v8 = vld [vmem:[%s824_s2 + $0x2] ss:$0 sm:$0xff] }
  0x25   : > { %271 = vperm.xlu0 %508, %v512_v2   ;;  %299 = vperm.xlu2 %510, %v517_v3   ;;  %vm212_vm0 = vcmask 1041408   ;;  %v208_v9 = vld [vmem:[%s740_s22] sm:$0x3]  ;;  %v209_v10 = vld [vmem:[%s740_s22 + $0x2] sm:$0x3]  ;;  %s440_s30 = sshll.u32 %s625_s15, 3 }
  0x26   : > { %v213_v11 = vsel %vm212_vm0, %v208_v9, 0.0  ;;  %v214_v12 = vsel %vm212_vm0, %v209_v10, 0.0  ;;  %v220_v13 = vmul.f32 %v208_v9, %v208_v9  ;;  %v221_v14 = vmul.f32 %v209_v10, %v209_v10  ;;  %v210_v15 = vld [vmem:[%s740_s22 + $0x4] sm:$0x3]  ;;  %v211_v21 = vld [vmem:[%s740_s22 + $0x6] sm:$0x3]  ;;  %s335_s6 = scalar_lea.hbm %s825_s3, %s440_s30 }
  0x27   : > { %v215_v16 = vadd.f32 %v214_v12, %v213_v11  ;;  %v216_v17 = vsel %vm212_vm0, %v210_v15, 0.0  ;;  %v222_v18 = vmul.f32 %v210_v15, %v210_v15  ;;  %v218_v24 = vsel %vm212_vm0, %v211_v21, 0.0  ;;  %s207_s22 = scalar_lea.vmem [#allocation5], %s432_s21  ;;  %s338_s21 = sshll.u32 %s335_s6, 4  ;;  %s339_s21 = int_to_ptr.hbm [resolvable:$true] %s338_s21 }
  0x28   : > { %v224_v19 = vsel %vm212_vm0, %v220_v13, 0.0  ;;  %v225_v20 = vsel %vm212_vm0, %v221_v14, 0.0  ;;  %v223_v25 = vmul.f32 %v211_v21, %v211_v21  ;;  %s336_s24 = sshll.u32 %s207_s22, 4  ;;  %s323_s15 = scalar_lea.sflag [#allocation4], %s734_s19  ;;  %s337_s24 = int_to_ptr.vmem [resolvable:$true] %s336_s24 }
  0x29   : > { %v217_v22 = vadd.f32 %v216_v17, %v215_v16  ;;  %v226_v23 = vadd.f32 %v225_v20, %v224_v19  ;;  %v227_v26 = vsel %vm212_vm0, %v222_v18, 0.0  ;;  %s565_s7 = sshra.s32 %s339_s21, 4  ;;  %s571_s11 = scalar_lea.hbm %s825_s3, 16  ;;  %s566_s7 = int_to_ptr.hbm [resolvable:$true] %s565_s7 }
  0x2a   : > { %v229_v29 = vsel %vm212_vm0, %v223_v25, 0.0  ;;  %s567_s8 = scalar_lea.hbm %s566_s7, 8  ;;  %p572_p7 = scmp.lt.s32.totalorder %s566_s7, %s825_s3 }
  0x2b   : > { %v219_v27 = vadd.f32 %v218_v24, %v217_v22  ;;  %v228_v28 = vadd.f32 %v227_v26, %v226_v23  ;;  %p568_p4 = scmp.ne.s32.totalorder %s566_s7, %s567_s8  ;;  %p573_p8 = scmp.lt.s32.totalorder %s571_s11, %s567_s8 }
  0x2c   : > { %283 = vperm.xlu1 %509, %v513_v4  }
  0x2d   : > { %275 = vperm.xlu0 %508, %v514_v5   ;;  %303 = vperm.xlu2 %510, %v518_v6   ;;  %v230_v30 = vadd.f32 %v229_v29, %v228_v28  ;;  %v231_v31 = vmul.f32 0.25, %v219_v27  ;;  %p569_p5 = pnand %p568_p4, %p711_p9  ;;  %p574_p10 = por %p573_p8, %p572_p7 }
  0x2f   : > { %v232_v32 = vmul.f32 0.25, %v230_v30  ;;  %v233_v33 = vmul.f32 %v231_v31, %v231_v31  ;;  %v254_v42 = vsub.f32 %v208_v9, %v231_v31  ;;  %v255_v49 = vsub.f32 %v209_v10, %v231_v31  ;;  %p570_p6 = pneg %p569_p5 }
  0x30   : > { %v257_v52 = vsub.f32 %v211_v21, %v231_v31  ;;  %v256_v53 = vsub.f32 %v210_v15, %v231_v31 }
  0x31   : > { %v234_v34 = vsub.f32 %v232_v32, %v233_v33  ;;  %p575_p13 = pnand %p574_p10, %p570_p6 }
  0x33   : > { %v235_v35 = vadd.f32 1e-05, %v234_v34 }
  0x34   : > { %311 = vperm.xlu1 %509, %v515_v7  }
  0x35   : > { %307 = vperm.xlu0 %508, %v516_v8   ;;  %519 = vrsqrt.f32 %v235_v35  ;;  %vm242_vm1 = vweird.f32 %v235_v35 }
  0x3b   : > { %v520_v36 = vpop.eup %519 }
  0x3c   : > { %v237_v37 = vmul.f32 %v520_v36, %v235_v35  ;;  %vm243_vm2 = vweird.f32 %v520_v36 }
  0x3d   : > { %vm244_vm3 = vmor %vm242_vm1, %vm243_vm2 }
  0x3e   : > { %v238_v38 = vmul.f32 %v520_v36, %v237_v37 }
  0x40   : > { %v239_v39 = vmul.f32 0.5, %v238_v38 }
  0x42   : > { %v240_v40 = vsub.f32 1.5, %v239_v39 }
  0x44   : > { %v241_v41 = vmul.f32 %v520_v36, %v240_v40 }
  0x46   : > { %v245_v43 = vsel %vm244_vm3, %v520_v36, %v241_v41 }
  0x47   : > { %v258_v44 = vmul.f32 %v254_v42, %v245_v43  ;;  %v259_v51 = vmul.f32 %v255_v49, %v245_v43  ;;  %v261_v58 = vmul.f32 %v257_v52, %v245_v43  ;;  %v260_v59 = vmul.f32 %v256_v53, %v245_v43 }
  0x7f   : > { %v300_v46 = vpop.permute.xlu2 %299 }
  0x87   : > { %v304_v57 = vpop.permute.xlu2 %303 }
  0x96   : > { %v280_v45 = vpop.permute.xlu1 %279 }
  0x97   : > { %v272_v47 = vpop.permute.xlu0 %271  ;;  %v288_v62 = vmul.f32 %v280_v45, %v260_v59 }
  0x98   : > { %v286_v48 = vmul.f32 %v272_v47, %v258_v44 }
  0x9a   : > { %v314_v50 = vadd.f32 %v300_v46, %v286_v48 }
  0x9c   : > { %318 = vst [vmem:[%s207_s22] sm:$0x3] %v314_v50 }
  0x9e   : > { %v284_v54 = vpop.permute.xlu1 %283 }
  0x9f   : > { %v276_v55 = vpop.permute.xlu0 %275  ;;  %v289_v61 = vmul.f32 %v284_v54, %v261_v58 }
  0xa0   : > { %v287_v56 = vmul.f32 %v276_v55, %v259_v51 }
  0xa2   : > { %v315_v60 = vadd.f32 %v304_v57, %v287_v56 }
  0xa4   : > { %319 = vst [vmem:[%s207_s22 + $0x2] sm:$0x3] %v315_v60 }
  0xa6   : > { %v312_v63 = vpop.permute.xlu1 %311 }
  0xa7   : > { %v317_v0 = vadd.f32 %v312_v63, %v289_v61  ;;  %v308_v1 = vpop.permute.xlu0 %307 }
  0xa8   : > { %v316_v2 = vadd.f32 %v308_v1, %v288_v62 }
  0xa9   : > { %321 = vst [vmem:[%s207_s22 + $0x6] sm:$0x3] %v317_v0 }
  0xaa   : > { %320 = vst [vmem:[%s207_s22 + $0x4] sm:$0x3] %v316_v2 }
  0xab   : > { %578 = shalt.err (!%p575_p13)
}
  0xac   : > { %s638_s19 = smov 32   ;;  %s639_s28 = smov 2  }
  0xad   : > { %443 = dma.vmem_to_hbm [thread:$0]  (%p711_p9), %s337_s24, 128, %s339_s21, %s323_s15, %s638_s19, %s638_s19, %s639_s28  }
  0xae PF: > { %s353_s29 = sand.u32 1, %s613_s12   ;;  %p450_p0 = pnand %p427_p12, %p718_p11 }
  0xaf   : > { %s354_s22 = scalar_lea.sflag [#allocation4], %s353_s29 }
  0xb0   : > { %p451_p1 = pneg %p450_p0 }
  0xb2   : > { %608 = dma.done.wait (%p451_p1), %s354_s22, 128  }
  0xb3   : > { %610 = vsyncadd (%p451_p1), %s354_s22, 4294967168  ;;  %s19_s17 = sadd.s32 1, %s633_s17   ;;  %s830_s12 = smov %s617_s13 }
  0xb4   : > { %p16_p2 = scmp.ge.s32.totalorder %s19_s17, 4   ;;  %s831_s13 = smov %s621_s14 }
  0xb5   : > { %s832_s14 = smov %s716_s26  ;;  %s833_s15 = smov %s629_s16 }
  0xb6   : > { %s834_s16 = smov %s836_s20  ;;  %18 = sbr.rel (!%p16_p2) target bundleno = 6 (0x6), region = 77 }
  0xbb   :  { %360 = vsyncpa [#allocation3], 1 }
  0xbc   :  { %362 = vsyncpa [#allocation3 + $0x1], 1 }
  0xbd   :  { %363 = vsyncpa [#allocation4], 1 }
  0xbe   :  { %365 = vsyncpa [#allocation4 + $0x1], 1 }

</bundles_post_ra>
